<compile_context>
chip_gen: v5e
topology: v5e:2x2
jax: 0.10.0
libtpu: 0.0.40
codegen_flags: <defaults>
</compile_context>

<pallas_src>
import jax
import jax.numpy as jnp
from jax.experimental import pallas as pl
from jax.experimental.pallas import tpu as pltpu


def _linear_kernel(x_ref, w_ref, b_ref, o_ref):
    # x_ref: [TM, D_in]; w_ref: [D_in, D_out]; b_ref: [1, D_out]; o_ref: [TM, D_out]
    acc = jnp.dot(x_ref[...], w_ref[...], preferred_element_type=jnp.float32)
    o_ref[...] = (acc + b_ref[...]).astype(o_ref.dtype)


def _cdiv(a, b):
    return -(-a // b)


def _round_up(n, m):
    return _cdiv(n, m) * m


# Conservative per-call VMEM budget for the streamed (double-buffered) batch tiles.
# Kept well under v5e's 16 MiB scoped default so no vmem_limit_bytes override is needed;
# leaves ample pipelining headroom on v6e (32/128 MiB) and v7x (32/64 MiB).
_VMEM_TILE_BUDGET_BYTES = 8 * 1024 * 1024
_MAX_BLOCK_BATCH = 8192
_SINGLE_SHOT_MAX_BATCH = 512


def logistic_regression_forward(x, weight, bias):
    """y = x @ weight.T + bias computed in a Pallas TPU kernel.

    x:      [B, D_in]      float32
    weight: [D_out, D_in]  float32 (PyTorch nn.Linear layout)
    bias:   [D_out]        float32
    """
    B, D_in = x.shape
    D_out = weight.shape[0]
    out_dtype = x.dtype

    # One-time parameter massaging (would be hoisted to param setup in a real model).
    w_t = weight.T                  # [D_in, D_out] — contraction on W's leading axis
    b_2d = bias.reshape(1, D_out)   # [1, D_out]

    # TODO(synk): for very wide D_in, add a K-tiling grid axis ("arbitrary") with an f32
    # VMEM accumulator; at these feature widths the whole feature axis fits one tile.

    if B <= _SINGLE_SHOT_MAX_BATCH:
        # Small batch: single invocation, whole arrays resident in VMEM, no grid loop,
        # no batch padding (whole-array blocks are exempt from the (8,128) rule).
        return pl.pallas_call(
            _linear_kernel,
            out_shape=jax.ShapeDtypeStruct((B, D_out), out_dtype),
            in_specs=[
                pl.BlockSpec(memory_space=pltpu.MemorySpace.VMEM),
                pl.BlockSpec(memory_space=pltpu.MemorySpace.VMEM),
                pl.BlockSpec(memory_space=pltpu.MemorySpace.VMEM),
            ],
            out_specs=pl.BlockSpec(memory_space=pltpu.MemorySpace.VMEM),
        )(x, w_t, b_2d)

    # Large batch: tile the batch axis.  TM from the VMEM budget (double-buffered f32
    # input + output rows); weight/bias are tiny and broadcast whole to every tile.
    bytes_per_row = 2 * 4 * (D_in + D_out)
    tm_budget = max(8, (_VMEM_TILE_BUDGET_BYTES // bytes_per_row) // 8 * 8)
    tm = min(_MAX_BLOCK_BATCH, tm_budget)
    # Keep at least 2 grid steps so ("parallel",) actually splits work across v7x's TCs.
    tm = min(tm, _round_up(_cdiv(B, 2), 8))
    grid_m = _cdiv(B, tm)  # partial final tile is masked by Pallas (no x / out padding)

    return pl.pallas_call(
        _linear_kernel,
        out_shape=jax.ShapeDtypeStruct((B, D_out), out_dtype),
        grid=(grid_m,),
        in_specs=[
            pl.BlockSpec((tm, D_in), lambda i: (i, 0)),
            pl.BlockSpec((D_in, D_out), lambda i: (0, 0)),
            pl.BlockSpec((1, D_out), lambda i: (0, 0)),
        ],
        out_specs=pl.BlockSpec((tm, D_out), lambda i: (i, 0)),
        compiler_params=pltpu.CompilerParams(
            dimension_semantics=("parallel",),  # v7x: shard batch tiles across both TCs
        ),
    )(x, w_t, b_2d)


def reference_forward(x, weight, bias):
    return x @ weight.T + bias


if __name__ == "__main__":
    # Small shapes consistent with the module: input_dim=32 features, output_dim=8 classes.
    batch = 8
    input_dim = 32
    output_dim = 8

    key = jax.random.PRNGKey(0)
    kx, kw, kb = jax.random.split(key, 3)

    x = jax.random.normal(kx, (batch, input_dim), dtype=jnp.float32)
    # Deterministic init mimicking nn.Linear's uniform(-1/sqrt(fan_in), +1/sqrt(fan_in)).
    bound = 1.0 / (input_dim ** 0.5)
    weight = jax.random.uniform(kw, (output_dim, input_dim), dtype=jnp.float32,
                                minval=-bound, maxval=bound)
    bias = jax.random.uniform(kb, (output_dim,), dtype=jnp.float32,
                              minval=-bound, maxval=bound)

    y = jax.block_until_ready(logistic_regression_forward(x, weight, bias))
    y_ref = reference_forward(x, weight, bias)
    assert y.shape == (batch, output_dim)
    assert jnp.allclose(y, y_ref, atol=1e-5, rtol=1e-5), "mismatch vs reference (small path)"

    # Exercise the tiled (large-batch) path: evenly-divisible and masked-tail cases.
    for big_b in (1200, 1000):
        xb = jax.random.normal(kx, (big_b, input_dim), dtype=jnp.float32)
        yb = jax.block_until_ready(logistic_regression_forward(xb, weight, bias))
        assert yb.shape == (big_b, output_dim)
        assert jnp.allclose(yb, reference_forward(xb, weight, bias),
                            atol=1e-5, rtol=1e-5), f"mismatch vs reference (B={big_b})"

    print("KERNEL_OK")
</pallas_src>

<mosaic_0001>
module attributes {stable_mosaic.version = 11 : i64} {
  func.func @_linear_kernel(%arg0: memref<8x32xf32, #tpu.memory_space<vmem>>, %arg1: memref<32x8xf32, #tpu.memory_space<vmem>>, %arg2: memref<1x8xf32, #tpu.memory_space<vmem>>, %arg3: memref<8x8xf32, #tpu.memory_space<vmem>>) attributes {dimension_semantics = [], scalar_prefetch = 0 : i64, scratch_operands = 0 : i64, tpu.core_type = #tpu.core_type<tc>} {
    %c0 = arith.constant 0 : index
    %c0_0 = arith.constant 0 : index
    %0 = vector.load %arg0[%c0, %c0_0] : memref<8x32xf32, #tpu.memory_space<vmem>>, vector<8x32xf32>
    %c0_1 = arith.constant 0 : index
    %c0_2 = arith.constant 0 : index
    %1 = vector.load %arg1[%c0_1, %c0_2] : memref<32x8xf32, #tpu.memory_space<vmem>>, vector<32x8xf32>
    %cst = arith.constant dense<0.000000e+00> : vector<8x8xf32>
    %2 = tpu.matmul %0, %1, %cst {dimension_numbers = #tpu.dot_dimension_numbers<[1], [0], [0], [1], [0, 0, 1, 1], [], []>} : vector<8x32xf32>, vector<32x8xf32>, vector<8x8xf32> -> vector<8x8xf32>
    %c0_3 = arith.constant 0 : index
    %c0_4 = arith.constant 0 : index
    %3 = vector.load %arg2[%c0_3, %c0_4] : memref<1x8xf32, #tpu.memory_space<vmem>>, vector<1x8xf32>
    %4 = vector.broadcast %3 : vector<1x8xf32> to vector<8x8xf32>
    %5 = arith.addf %2, %4 : vector<8x8xf32>
    %c0_5 = arith.constant 0 : index
    %c0_6 = arith.constant 0 : index
    %6 = vector.load %arg3[%c0_5, %c0_6] : memref<8x8xf32, #tpu.memory_space<vmem>>, vector<8x8xf32>
    tpu.vector_store %arg3[%c0_5, %c0_6], %5 {strides = array<i32>} : memref<8x8xf32, #tpu.memory_space<vmem>>, vector<8x8xf32>,
    return
  }
}

</mosaic_0001>

<bundles_post_ra>
// kernel: tpu_custom_call.1
= control target key start
LH: loop header
LB: loop body
LE: loop exit
PB: predicated region body
PF: predicated region fallthrough
CT: control target
= control target key end

     0   :  { %s137_s0 = inlined_call_operand.vmem [shape: f32[8,32], index: 0, kind: input, shape index: {}]   ;;  %s138_s1 = inlined_call_operand.vmem [shape: f32[32,8], index: 1, kind: input, shape index: {}]   ;;  %s139_s2 = inlined_call_operand.vmem [shape: f32[1,8], index: 2, kind: input, shape index: {}]   ;;  %s140_s3 = inlined_call_operand.hbm [shape: f32[8,8], index: 3, kind: output, shape index: {}]  }
   0x1   :  { %v19_v0 = vld [vmem:[%s138_s1 + $0x18] sm:$0xff]  ;;  %v18_v1 = vld [vmem:[%s138_s1 + $0x10] sm:$0xff]  ;;  %v17_v2 = vld [vmem:[%s138_s1 + $0x8] sm:$0xff] }
   0x2   :  { %40 = vmatpush.msra.mxu0 %v19_v0 }
   0x3   :  { %8 = vsyncpa [#allocation3], 0  ;;  %v16_v3 = vld [vmem:[%s138_s1] sm:$0xff]  ;;  %vm24_vm0 = vcmask 261120   ;;  %s95_s24 = smov [#allocation2]   ;;  %s57_s28 = sshll.u32 %s140_s3, 4  ;;  %s58_s28 = int_to_ptr.hbm [resolvable:$true] %s57_s28 }
   0x4   :  { %41 = vmatpush.msra.mxu0 %v18_v1  ;;  %v15_v4 = vld [vmem:[%s137_s0] sm:$0xff]  ;;  %s55_s25 = sshll.u32 %s95_s24, 4  ;;  %vm48_vm1 = vcmask 64512   ;;  %s56_s25 = int_to_ptr.vmem [resolvable:$true] %s55_s25 }
   0x5   :  { %v68_v5 = vld [vmem:[%s139_s2] ss:$0 sm:$0xff] }
   0x6   :  { %42 = vmatpush.msra.mxu0 %v17_v2 }
   0x8   :  { %43 = vmatpush.msra.mxu0 %v16_v3 }
   0x9   :  { %66 = vmatmul.msk.f32.vlgmr.msra.gmra.mxu0 %vm24_vm0, %v15_v4 }
  0x86   :  { %v45_v6 = vpop.f32.mrf.mxu0 }
  0x87   :  { %v46_v7 = vadd.f32 %v68_v5, %v45_v6 }
  0x89   :  { %49 = vst.msk [vmem:[#allocation2] sm:$0xff] %vm48_vm1, %v46_v7 }
  0x8a   :  { %60 = dma.vmem_to_hbm [thread:$0]  %s56_s25, 128, %s58_s28, [#allocation3]  }
  0x8b   :  { %93 = dma.done.wait [#allocation3], 128  }
  0x8c   :  { %94 = vsyncadd [#allocation3], 4294967168 }
  0x8d   :  { %65 = vsyncpa [#allocation3], 1 }

</bundles_post_ra>
